<compile_context>
chip_gen: v7x
topology: tpu7x:2x2x1
jax: 0.10.0
libtpu: 0.0.40
codegen_flags: <defaults>
</compile_context>

<pallas_src>
import functools

import jax
import jax.numpy as jnp
from jax.experimental import pallas as pl
from jax.experimental.pallas import tpu as pltpu

LANE = 128                       # TPU lane width; hidden/feature dims padded to this
TILE = 256                       # row / k tile size for the tiled aggregation path
FUSED_MAX_NODES = 1024           # use the single fused kernel when N_pad <= this
VMEM_LIMIT = 48 * 1024 * 1024    # safe on v5e/v6e (128 MiB) and v7x (64 MiB physical)


def _round_up(x, m):
    return (x + m - 1) // m * m


# =====================  fused 2-layer kernel (small graphs)  =====================

def _fused_gcn2_kernel(adj_ref, x_ref, w1_ref, b1_ref, w2_ref, b2_ref,
                       out_ref, xw_ref, h1_ref):
    # Layer 1 feature transform: XW1 = X @ W1  (bf16 in, f32 acc, bf16 staged)
    xw_ref[...] = jnp.dot(
        x_ref[...], w1_ref[...],
        preferred_element_type=jnp.float32).astype(jnp.bfloat16)
    # Layer 1 aggregation + bias + ReLU, staged bf16 for the next matmul.
    h1 = jnp.dot(adj_ref[...], xw_ref[...],
                 preferred_element_type=jnp.float32) + b1_ref[...]
    h1_ref[...] = jnp.maximum(h1, 0.0).astype(jnp.bfloat16)
    # (dropout between layers is identity in eval mode)
    # Layer 2 feature transform.
    xw_ref[...] = jnp.dot(
        h1_ref[...], w2_ref[...],
        preferred_element_type=jnp.float32).astype(jnp.bfloat16)
    # Layer 2 aggregation + bias + ReLU.
    h2 = jnp.dot(adj_ref[...], xw_ref[...],
                 preferred_element_type=jnp.float32) + b2_ref[...]
    out_ref[...] = jnp.maximum(h2, 0.0).astype(out_ref.dtype)


def gcn2_fused(adj, x, w1, b1, w2, b2):
    """Both GCN layers in one pallas_call; adj stays VMEM-resident (read once)."""
    n = adj.shape[0]
    n_pad = _round_up(max(n, LANE), LANE)
    nfeat = x.shape[1]
    f_pad = _round_up(nfeat, LANE)
    nhid = w1.shape[1]
    h_pad = _round_up(nhid, LANE)

    # Zero padding: padded adj rows/cols are zero, so padded node rows cannot
    # contaminate real output rows; padded feature/hidden columns stay zero.
    adj_p = jnp.zeros((n_pad, n_pad), jnp.bfloat16).at[:n, :n].set(
        adj.astype(jnp.bfloat16))
    x_p = jnp.zeros((n_pad, f_pad), jnp.bfloat16).at[:n, :nfeat].set(
        x.astype(jnp.bfloat16))
    w1_p = jnp.zeros((f_pad, h_pad), jnp.bfloat16).at[:nfeat, :nhid].set(
        w1.astype(jnp.bfloat16))
    b1_p = jnp.zeros((1, h_pad), jnp.float32).at[0, :nhid].set(b1)
    w2_p = jnp.zeros((h_pad, h_pad), jnp.bfloat16).at[:nhid, :nhid].set(
        w2.astype(jnp.bfloat16))
    b2_p = jnp.zeros((1, h_pad), jnp.float32).at[0, :nhid].set(b2)

    flops = (2 * n_pad * f_pad * h_pad          # X @ W1
             + 2 * n_pad * n_pad * h_pad        # adj @ XW1
             + 2 * n_pad * h_pad * h_pad        # h1 @ W2
             + 2 * n_pad * n_pad * h_pad)       # adj @ XW2
    bytes_accessed = (n_pad * n_pad * 2 + n_pad * f_pad * 2
                      + f_pad * h_pad * 2 + h_pad * h_pad * 2
                      + 2 * h_pad * 4 + n_pad * h_pad * 4)

    out = pl.pallas_call(
        _fused_gcn2_kernel,
        grid=(1,),
        in_specs=[
            pl.BlockSpec((n_pad, n_pad), lambda i: (0, 0)),   # adj, VMEM-resident
            pl.BlockSpec((n_pad, f_pad), lambda i: (0, 0)),   # X
            pl.BlockSpec((f_pad, h_pad), lambda i: (0, 0)),   # W1
            pl.BlockSpec((1, h_pad), lambda i: (0, 0)),       # b1
            pl.BlockSpec((h_pad, h_pad), lambda i: (0, 0)),   # W2
            pl.BlockSpec((1, h_pad), lambda i: (0, 0)),       # b2
        ],
        out_specs=pl.BlockSpec((n_pad, h_pad), lambda i: (0, 0)),
        out_shape=jax.ShapeDtypeStruct((n_pad, h_pad), jnp.float32),
        scratch_shapes=[pltpu.VMEM((n_pad, h_pad), jnp.bfloat16),   # XW staging
                        pltpu.VMEM((n_pad, h_pad), jnp.bfloat16)],  # h1 staging
        compiler_params=pltpu.CompilerParams(
            dimension_semantics=("arbitrary",),
            vmem_limit_bytes=VMEM_LIMIT),
        cost_estimate=pl.CostEstimate(
            flops=flops, transcendentals=0, bytes_accessed=bytes_accessed),
    )(adj_p, x_p, w1_p, b1_p, w2_p, b2_p)
    return out[:n, :nhid]


# ================  tiled path (large graphs / arbitrary layer count)  ============

# --------------------- kernel 1: feature transform X @ W -------------------

def _xw_kernel(x_ref, w_ref, out_ref):
    # Cast to bf16 for MXU throughput; accumulate in f32; emit bf16 for the
    # downstream aggregation matmul.
    x = x_ref[...].astype(jnp.bfloat16)
    w = w_ref[...].astype(jnp.bfloat16)
    out_ref[...] = jnp.dot(
        x, w, preferred_element_type=jnp.float32).astype(out_ref.dtype)


def feature_transform(x_pad, w_pad, tile_m):
    """(N_pad, F) @ (F, HPAD) -> (N_pad, HPAD) bf16, tiled over rows."""
    n_pad, f = x_pad.shape
    hpad = w_pad.shape[1]
    flops = 2 * n_pad * f * hpad
    bytes_accessed = (n_pad * f * x_pad.dtype.itemsize
                      + f * hpad * w_pad.dtype.itemsize + n_pad * hpad * 2)
    return pl.pallas_call(
        _xw_kernel,
        grid=(n_pad // tile_m,),
        in_specs=[
            pl.BlockSpec((tile_m, f), lambda i: (i, 0)),
            pl.BlockSpec((f, hpad), lambda i: (0, 0)),      # weights VMEM-resident
        ],
        out_specs=pl.BlockSpec((tile_m, hpad), lambda i: (i, 0)),
        out_shape=jax.ShapeDtypeStruct((n_pad, hpad), jnp.bfloat16),
        compiler_params=pltpu.CompilerParams(
            dimension_semantics=("parallel",),
            vmem_limit_bytes=VMEM_LIMIT),
        cost_estimate=pl.CostEstimate(
            flops=flops, transcendentals=0, bytes_accessed=bytes_accessed),
    )(x_pad, w_pad)


# ------------- kernel 2: aggregation relu(adj @ XW + b), tiled --------------

def _agg_kernel(adj_ref, xw_ref, b_ref, out_ref, acc_ref, *, tile_k):
    k = pl.program_id(1)

    @pl.when(k == 0)
    def _():
        acc_ref[...] = jnp.zeros_like(acc_ref)

    # XW is fully VMEM-resident; slice out the k-block matching this adj tile.
    kstart = pl.multiple_of(k * tile_k, tile_k)
    xw_blk = xw_ref[pl.ds(kstart, tile_k), :]
    acc_ref[...] += jnp.dot(adj_ref[...], xw_blk,
                            preferred_element_type=jnp.float32)

    @pl.when(k == pl.num_programs(1) - 1)
    def _():
        out_ref[...] = jnp.maximum(acc_ref[...] + b_ref[...], 0.0).astype(
            out_ref.dtype)


def gcn_aggregate(adj_bf16, xw_bf16, b_pad, tile_m, tile_k):
    """relu(adj @ XW + b): adj (N_pad,N_pad) bf16 streamed, XW (N_pad,HPAD) resident."""
    n_pad = adj_bf16.shape[0]
    hpad = xw_bf16.shape[1]
    flops = 2 * n_pad * n_pad * hpad
    bytes_accessed = n_pad * n_pad * 2 + n_pad * hpad * 2 + n_pad * hpad * 4
    kernel = functools.partial(_agg_kernel, tile_k=tile_k)
    return pl.pallas_call(
        kernel,
        grid=(n_pad // tile_m, n_pad // tile_k),          # reduction axis last
        in_specs=[
            pl.BlockSpec((tile_m, tile_k), lambda i, k: (i, k)),   # stream adj tiles
            pl.BlockSpec((n_pad, hpad), lambda i, k: (0, 0)),      # XW resident
            pl.BlockSpec((1, hpad), lambda i, k: (0, 0)),          # bias resident
        ],
        out_specs=pl.BlockSpec((tile_m, hpad), lambda i, k: (i, 0)),
        out_shape=jax.ShapeDtypeStruct((n_pad, hpad), jnp.float32),
        scratch_shapes=[pltpu.VMEM((tile_m, hpad), jnp.float32)],
        compiler_params=pltpu.CompilerParams(
            dimension_semantics=("parallel", "arbitrary"),
            vmem_limit_bytes=VMEM_LIMIT),
        cost_estimate=pl.CostEstimate(
            flops=flops, transcendentals=0, bytes_accessed=bytes_accessed),
    )(adj_bf16, xw_bf16, b_pad)


# ------------------------------ JAX glue ---------------------------------

def gcn_norm_dense(edge_index, edge_weight, num_nodes):
    """Dense D^{-1/2}(A+I)D^{-1/2}, matching torch_geometric gcn_norm.

    edge_index[0] = source nodes, edge_index[1] = target nodes;
    aggregation flows source -> target, so A[dst, src] = w(src->dst).
    """
    src = edge_index[0]
    dst = edge_index[1]
    if edge_weight is None:
        edge_weight = jnp.ones(src.shape[0], dtype=jnp.float32)
    a = jnp.zeros((num_nodes, num_nodes), dtype=jnp.float32)
    a = a.at[dst, src].add(edge_weight.astype(jnp.float32))
    a = a + jnp.eye(num_nodes, dtype=jnp.float32)          # self loops, weight 1
    deg = a.sum(axis=1)
    dinv = jnp.where(deg > 0.0, 1.0 / jnp.sqrt(deg), 0.0)
    return dinv[:, None] * a * dinv[None, :]


def glorot(key, fan_in, fan_out):
    limit = jnp.sqrt(6.0 / (fan_in + fan_out))
    return jax.random.uniform(key, (fan_in, fan_out), jnp.float32,
                              minval=-limit, maxval=limit)


def init_gcn_body_params(key, nfeat, nhid, layer=2):
    params = []
    dims = [nfeat] + [nhid] * layer
    for li in range(layer):
        key, wk = jax.random.split(key)
        w = glorot(wk, dims[li], dims[li + 1])              # GCNConv glorot init
        b = jnp.zeros((dims[li + 1],), jnp.float32)         # GCNConv zero bias
        params.append((w, b))
    return params


def gcn_body_forward(x, edge_index, params, edge_weight=None,
                     layer_norm_first=False, use_ln=False,
                     tile=TILE, force_tiled=False):
    """Forward pass of GCN_body (eval mode, default flags)."""
    # TODO(synk): layer_norm_first / use_ln LayerNorm branches (default off)
    #             and training-mode dropout are not implemented.
    n = x.shape[0]
    adj = gcn_norm_dense(edge_index, edge_weight, n)

    # ---- fused single-kernel path for 2-layer configs that fit in VMEM ----
    n_pad_fused = _round_up(max(n, LANE), LANE)
    can_fuse = (not force_tiled
                and len(params) == 2
                and params[0][0].shape[1] == params[1][0].shape[0]
                and n_pad_fused <= FUSED_MAX_NODES)
    if can_fuse:
        (w1, b1), (w2, b2) = params
        return gcn2_fused(adj, x, w1, b1, w2, b2)

    # -------------------------- tiled fallback path --------------------------
    # Pad node count to the tile size; padded adj rows/cols are zero so they
    # cannot contaminate real rows, and padded output rows are sliced away.
    n_pad = _round_up(n, tile)
    adj_pad = jnp.zeros((n_pad, n_pad), jnp.float32).at[:n, :n].set(adj)
    adj_bf16 = adj_pad.astype(jnp.bfloat16)     # halve HBM traffic on the big stream

    h = jnp.zeros((n_pad, x.shape[1]), jnp.float32).at[:n, :].set(
        x.astype(jnp.float32))

    fout = None
    for (w, b) in params:
        fin, fout = w.shape
        hpad = _round_up(fout, LANE)
        in_width = h.shape[1]                   # may already be lane-padded
        w_pad = jnp.zeros((in_width, hpad), jnp.float32).at[:fin, :fout].set(w)
        b_pad = jnp.zeros((1, hpad), jnp.float32).at[0, :fout].set(b)

        xw = feature_transform(h, w_pad, tile)               # (n_pad, hpad) bf16
        h = gcn_aggregate(adj_bf16, xw, b_pad, tile, tile)   # (n_pad, hpad) f32
        # F.dropout(..., training=False) -> identity

    return h[:n, :fout]


# -------------------------------- main ------------------------------------

if __name__ == "__main__":
    key = jax.random.PRNGKey(0)

    num_nodes = 8
    nfeat = 16
    nhid = 32
    layer = 2

    # deterministic node features
    key, xk = jax.random.split(key)
    x = jax.random.normal(xk, (num_nodes, nfeat), jnp.float32)

    # small deterministic (undirected) edge list: 2 x E
    src = jnp.array([0, 1, 1, 2, 2, 3, 3, 4, 4, 5, 5, 6, 6, 7], jnp.int32)
    dst = jnp.array([1, 0, 2, 1, 3, 2, 4, 3, 5, 4, 6, 5, 7, 6], jnp.int32)
    edge_index = jnp.stack([src, dst], axis=0)
    edge_weight = None

    params = init_gcn_body_params(key, nfeat, nhid, layer=layer)

    # Fused single-kernel path (default for this size) and the tiled fallback.
    out_fused = gcn_body_forward(x, edge_index, params, edge_weight)
    out_tiled = gcn_body_forward(x, edge_index, params, edge_weight,
                                 force_tiled=True)
    out_fused, out_tiled = jax.block_until_ready((out_fused, out_tiled))

    assert out_fused.shape == (num_nodes, nhid)
    assert out_tiled.shape == (num_nodes, nhid)
    assert bool(jnp.all(jnp.isfinite(out_fused)))
    assert bool(jnp.all(out_fused >= 0.0))   # ReLU output

    # reference check in plain JAX (f32) — bf16 adj/feature stream ~1e-2 rel error
    adj_ref = gcn_norm_dense(edge_index, edge_weight, num_nodes)
    h_ref = x
    for (w, b) in params:
        h_ref = jnp.maximum(adj_ref @ (h_ref @ w) + b, 0.0)
    assert bool(jnp.allclose(out_fused, h_ref, rtol=5e-2, atol=5e-2))
    assert bool(jnp.allclose(out_tiled, h_ref, rtol=5e-2, atol=5e-2))

    print("KERNEL_OK")
</pallas_src>

<mosaic_0001>
module attributes {stable_mosaic.version = 11 : i64} {
  func.func @_fused_gcn2_kernel(%arg0: i32, %arg1: memref<128x128xbf16, #tpu.memory_space<vmem>>, %arg2: memref<128x128xbf16, #tpu.memory_space<vmem>>, %arg3: memref<128x128xbf16, #tpu.memory_space<vmem>>, %arg4: memref<1x128xf32, #tpu.memory_space<vmem>>, %arg5: memref<128x128xbf16, #tpu.memory_space<vmem>>, %arg6: memref<1x128xf32, #tpu.memory_space<vmem>>, %arg7: memref<128x128xf32, #tpu.memory_space<vmem>>, %arg8: memref<128x128xbf16, #tpu.memory_space<vmem>>, %arg9: memref<128x128xbf16, #tpu.memory_space<vmem>>) attributes {dimension_semantics = [#tpu.dimension_semantics<arbitrary>], iteration_bounds = array<i64: 1>, scalar_prefetch = 0 : i64, scratch_operands = 2 : i64, tpu.core_type = #tpu.core_type<tc>, window_params = [{pipeline_mode = #tpu.pipeline_mode<synchronous>, transform_indices = @transform_0, window_bounds = array<i64: 128, 128>}, {pipeline_mode = #tpu.pipeline_mode<synchronous>, transform_indices = @transform_1, window_bounds = array<i64: 128, 128>}, {pipeline_mode = #tpu.pipeline_mode<synchronous>, transform_indices = @transform_2, window_bounds = array<i64: 128, 128>}, {pipeline_mode = #tpu.pipeline_mode<synchronous>, transform_indices = @transform_3, window_bounds = array<i64: 1, 128>}, {pipeline_mode = #tpu.pipeline_mode<synchronous>, transform_indices = @transform_4, window_bounds = array<i64: 128, 128>}, {pipeline_mode = #tpu.pipeline_mode<synchronous>, transform_indices = @transform_5, window_bounds = array<i64: 1, 128>}, {pipeline_mode = #tpu.pipeline_mode<synchronous>, transform_indices = @transform_6, window_bounds = array<i64: 128, 128>}]} {
    %c0 = arith.constant 0 : index
    %c0_0 = arith.constant 0 : index
    %0 = vector.load %arg2[%c0, %c0_0] : memref<128x128xbf16, #tpu.memory_space<vmem>>, vector<128x128xbf16>
    %c0_1 = arith.constant 0 : index
    %c0_2 = arith.constant 0 : index
    %1 = vector.load %arg3[%c0_1, %c0_2] : memref<128x128xbf16, #tpu.memory_space<vmem>>, vector<128x128xbf16>
    %cst = arith.constant dense<0.000000e+00> : vector<128x128xf32>
    %2 = tpu.matmul %0, %1, %cst {dimension_numbers = #tpu.dot_dimension_numbers<[1], [0], [0], [1], [0, 0, 1, 1], [], []>} : vector<128x128xbf16>, vector<128x128xbf16>, vector<128x128xf32> -> vector<128x128xf32>
    %3 = arith.truncf %2 : vector<128x128xf32> to vector<128x128xbf16>
    %c0_3 = arith.constant 0 : index
    %c0_4 = arith.constant 0 : index
    %4 = vector.load %arg8[%c0_3, %c0_4] : memref<128x128xbf16, #tpu.memory_space<vmem>>, vector<128x128xbf16>
    tpu.vector_store %arg8[%c0_3, %c0_4], %3 {strides = array<i32>} : memref<128x128xbf16, #tpu.memory_space<vmem>>, vector<128x128xbf16>,
    %c0_5 = arith.constant 0 : index
    %c0_6 = arith.constant 0 : index
    %5 = vector.load %arg1[%c0_5, %c0_6] : memref<128x128xbf16, #tpu.memory_space<vmem>>, vector<128x128xbf16>
    %c0_7 = arith.constant 0 : index
    %c0_8 = arith.constant 0 : index
    %6 = vector.load %arg8[%c0_7, %c0_8] : memref<128x128xbf16, #tpu.memory_space<vmem>>, vector<128x128xbf16>
    %cst_9 = arith.constant dense<0.000000e+00> : vector<128x128xf32>
    %7 = tpu.matmul %5, %6, %cst_9 {dimension_numbers = #tpu.dot_dimension_numbers<[1], [0], [0], [1], [0, 0, 1, 1], [], []>} : vector<128x128xbf16>, vector<128x128xbf16>, vector<128x128xf32> -> vector<128x128xf32>
    %c0_10 = arith.constant 0 : index
    %c0_11 = arith.constant 0 : index
    %8 = vector.load %arg4[%c0_10, %c0_11] : memref<1x128xf32, #tpu.memory_space<vmem>>, vector<1x128xf32>
    %9 = vector.broadcast %8 : vector<1x128xf32> to vector<128x128xf32>
    %10 = arith.addf %7, %9 : vector<128x128xf32>
    %cst_12 = arith.constant 0.000000e+00 : f32
    %11 = vector.broadcast %cst_12 : f32 to vector<128x128xf32>
    %12 = arith.maximumf %10, %11 : vector<128x128xf32>
    %13 = arith.truncf %12 : vector<128x128xf32> to vector<128x128xbf16>
    %c0_13 = arith.constant 0 : index
    %c0_14 = arith.constant 0 : index
    %14 = vector.load %arg9[%c0_13, %c0_14] : memref<128x128xbf16, #tpu.memory_space<vmem>>, vector<128x128xbf16>
    tpu.vector_store %arg9[%c0_13, %c0_14], %13 {strides = array<i32>} : memref<128x128xbf16, #tpu.memory_space<vmem>>, vector<128x128xbf16>,
    %c0_15 = arith.constant 0 : index
    %c0_16 = arith.constant 0 : index
    %15 = vector.load %arg9[%c0_15, %c0_16] : memref<128x128xbf16, #tpu.memory_space<vmem>>, vector<128x128xbf16>
    %c0_17 = arith.constant 0 : index
    %c0_18 = arith.constant 0 : index
    %16 = vector.load %arg5[%c0_17, %c0_18] : memref<128x128xbf16, #tpu.memory_space<vmem>>, vector<128x128xbf16>
    %cst_19 = arith.constant dense<0.000000e+00> : vector<128x128xf32>
    %17 = tpu.matmul %15, %16, %cst_19 {dimension_numbers = #tpu.dot_dimension_numbers<[1], [0], [0], [1], [0, 0, 1, 1], [], []>} : vector<128x128xbf16>, vector<128x128xbf16>, vector<128x128xf32> -> vector<128x128xf32>
    %18 = arith.truncf %17 : vector<128x128xf32> to vector<128x128xbf16>
    %c0_20 = arith.constant 0 : index
    %c0_21 = arith.constant 0 : index
    %19 = vector.load %arg8[%c0_20, %c0_21] : memref<128x128xbf16, #tpu.memory_space<vmem>>, vector<128x128xbf16>
    tpu.vector_store %arg8[%c0_20, %c0_21], %18 {strides = array<i32>} : memref<128x128xbf16, #tpu.memory_space<vmem>>, vector<128x128xbf16>,
    %c0_22 = arith.constant 0 : index
    %c0_23 = arith.constant 0 : index
    %20 = vector.load %arg1[%c0_22, %c0_23] : memref<128x128xbf16, #tpu.memory_space<vmem>>, vector<128x128xbf16>
    %c0_24 = arith.constant 0 : index
    %c0_25 = arith.constant 0 : index
    %21 = vector.load %arg8[%c0_24, %c0_25] : memref<128x128xbf16, #tpu.memory_space<vmem>>, vector<128x128xbf16>
    %cst_26 = arith.constant dense<0.000000e+00> : vector<128x128xf32>
    %22 = tpu.matmul %20, %21, %cst_26 {dimension_numbers = #tpu.dot_dimension_numbers<[1], [0], [0], [1], [0, 0, 1, 1], [], []>} : vector<128x128xbf16>, vector<128x128xbf16>, vector<128x128xf32> -> vector<128x128xf32>
    %c0_27 = arith.constant 0 : index
    %c0_28 = arith.constant 0 : index
    %23 = vector.load %arg6[%c0_27, %c0_28] : memref<1x128xf32, #tpu.memory_space<vmem>>, vector<1x128xf32>
    %24 = vector.broadcast %23 : vector<1x128xf32> to vector<128x128xf32>
    %25 = arith.addf %22, %24 : vector<128x128xf32>
    %cst_29 = arith.constant 0.000000e+00 : f32
    %26 = vector.broadcast %cst_29 : f32 to vector<128x128xf32>
    %27 = arith.maximumf %25, %26 : vector<128x128xf32>
    %c0_30 = arith.constant 0 : index
    %c0_31 = arith.constant 0 : index
    %28 = vector.load %arg7[%c0_30, %c0_31] : memref<128x128xf32, #tpu.memory_space<vmem>>, vector<128x128xf32>
    tpu.vector_store %arg7[%c0_30, %c0_31], %27 {strides = array<i32>} : memref<128x128xf32, #tpu.memory_space<vmem>>, vector<128x128xf32>,
    return
  }
  func.func @transform_0(%arg0: i32) -> (i32, i32) {
    %c0_i32 = arith.constant 0 : i32
    %c0_i32_0 = arith.constant 0 : i32
    %c0_i32_1 = arith.constant 0 : i32
    return %c0_i32, %c0_i32_0 : i32, i32
  }
  func.func @transform_1(%arg0: i32) -> (i32, i32) {
    %c0_i32 = arith.constant 0 : i32
    %c0_i32_0 = arith.constant 0 : i32
    %c0_i32_1 = arith.constant 0 : i32
    return %c0_i32, %c0_i32_0 : i32, i32
  }
  func.func @transform_2(%arg0: i32) -> (i32, i32) {
    %c0_i32 = arith.constant 0 : i32
    %c0_i32_0 = arith.constant 0 : i32
    %c0_i32_1 = arith.constant 0 : i32
    return %c0_i32, %c0_i32_0 : i32, i32
  }
  func.func @transform_3(%arg0: i32) -> (i32, i32) {
    %c0_i32 = arith.constant 0 : i32
    %c0_i32_0 = arith.constant 0 : i32
    %c0_i32_1 = arith.constant 0 : i32
    return %c0_i32, %c0_i32_0 : i32, i32
  }
  func.func @transform_4(%arg0: i32) -> (i32, i32) {
    %c0_i32 = arith.constant 0 : i32
    %c0_i32_0 = arith.constant 0 : i32
    %c0_i32_1 = arith.constant 0 : i32
    return %c0_i32, %c0_i32_0 : i32, i32
  }
  func.func @transform_5(%arg0: i32) -> (i32, i32) {
    %c0_i32 = arith.constant 0 : i32
    %c0_i32_0 = arith.constant 0 : i32
    %c0_i32_1 = arith.constant 0 : i32
    return %c0_i32, %c0_i32_0 : i32, i32
  }
  func.func @transform_6(%arg0: i32) -> (i32, i32) {
    %c0_i32 = arith.constant 0 : i32
    %c0_i32_0 = arith.constant 0 : i32
    %c0_i32_1 = arith.constant 0 : i32
    return %c0_i32, %c0_i32_0 : i32, i32
  }
}

</mosaic_0001>

<bundles_post_ra>
// kernel: tpu_custom_call.1
= control target key start
LH: loop header
LB: loop body
LE: loop exit
PB: predicated region body
PF: predicated region fallthrough
CT: control target
= control target key end

     0   :  { %11 = vsyncpa [#allocation5], 0  ;;  %s1478_s0 = inlined_call_operand.hbm [shape: bf16[128,128], index: 0, kind: input, shape index: {}]   ;;  %s1479_s1 = inlined_call_operand.hbm [shape: bf16[128,128], index: 1, kind: input, shape index: {}]   ;;  %s1480_s2 = inlined_call_operand.hbm [shape: bf16[128,128], index: 2, kind: input, shape index: {}]   ;;  %s1481_s3 = inlined_call_operand.vmem [shape: f32[1,128], index: 3, kind: input, shape index: {}]   ;;  %s1482_s4 = inlined_call_operand.hbm [shape: bf16[128,128], index: 4, kind: input, shape index: {}]   ;;  %s1483_s5 = inlined_call_operand.vmem [shape: f32[1,128], index: 5, kind: input, shape index: {}]   ;;  %s1484_s6 = inlined_call_operand.hbm [shape: f32[128,128], index: 6, kind: output, shape index: {}]  }
   0x1   :  { %12 = vsyncpa [#allocation8], 0 }
   0x2   :  { %13 = vsyncpa [#allocation11], 0 }
   0x3   :  { %14 = vsyncpa [#allocation6], 0  ;;  %s1342_s21 = smov [#allocation7]   ;;  %s1343_s23 = smov [#allocation4]  }
   0x4   :  { %s32_s22 = sshll.u32 %s1342_s21, 4  ;;  %s20_s24 = sshll.u32 %s1343_s23, 4  ;;  %s33_s22 = int_to_ptr.vmem [resolvable:$true] %s32_s22  ;;  %s1386_s24 = int_to_ptr.vmem [resolvable:$true] %s20_s24 }
   0x5   :  { %s1224_s27 = scalar_lea.hbm %s1479_s1, 1024 }
   0x6   :  { %p1225_p0 = scmp.ne.s32.totalorder %s1479_s1, %s1224_s27  ;;  %p1228_p1 = scmp.lt.u32.totalorder %s1224_s27, %s1479_s1 }
   0x8   :  { %p1230_p2 = pnand %p1228_p1, %p1225_p0 }
   0xa   :  { %1233 = shalt.err (!%p1230_p2)
}
   0xb   :  { %s1234_s8 = scalar_lea.vmem %s33_s22, 1024  ;;  %p1239_p4 = scmp.lt.s32.totalorder %s33_s22, %s33_s22 }
   0xc   :  { %p1235_p3 = scmp.ne.s32.totalorder %s33_s22, %s1234_s8  ;;  %p1240_p5 = scmp.lt.s32.totalorder %s1234_s8, %s1234_s8 }
   0xe   :  { %p1241_p6 = por %p1240_p5, %p1239_p4 }
  0x10   :  { %p1242_p7 = pnand %p1241_p6, %p1235_p3 }
  0x12   :  { %1245 = shalt.err (!%p1242_p7)
}
  0x13   :  { %s1344_s9 = smov 64   ;;  %s1345_s10 = smov 4  }
  0x14   :  { %38 = dma.hbm_to_vmem [thread:$0]  %s1479_s1, 1024, %s33_s22, [#allocation8], %s1344_s9, %s1344_s9, %s1345_s10  }
  0x15   :  { %s1246_s15 = scalar_lea.hbm %s1478_s0, 1024 }
  0x16   :  { %p1247_p8 = scmp.ne.s32.totalorder %s1478_s0, %s1246_s15  ;;  %p1250_p9 = scmp.lt.u32.totalorder %s1246_s15, %s1478_s0 }
  0x18   :  { %p1252_p10 = pnand %p1250_p9, %p1247_p8 }
  0x1a   :  { %1255 = shalt.err (!%p1252_p10)
}
  0x1b   :  { %s1256_s20 = scalar_lea.vmem %s1386_s24, 1024  ;;  %p1261_p12 = scmp.lt.s32.totalorder %s1386_s24, %s1386_s24 }
  0x1c   :  { %p1257_p11 = scmp.ne.s32.totalorder %s1386_s24, %s1256_s20  ;;  %p1262_p13 = scmp.lt.s32.totalorder %s1256_s20, %s1256_s20 }
  0x1e   :  { %p1263_p0 = por %p1262_p13, %p1261_p12 }
  0x20   :  { %p1264_p1 = pnand %p1263_p0, %p1257_p11 }
  0x22   :  { %1267 = shalt.err (!%p1264_p1)
}
  0x23   :  { %26 = dma.hbm_to_vmem [thread:$0]  %s1478_s0, 1024, %s1386_s24, [#allocation5], %s1344_s9, %s1344_s9, %s1345_s10  }
  0x24   :  { %s1346_s22 = smov [#allocation9]   ;;  %s1347_s25 = smov [#allocation10]  }
  0x25   :  { %s44_s23 = sshll.u32 %s1346_s22, 4  ;;  %s58_s26 = sshll.u32 %s1347_s25, 4  ;;  %s45_s23 = int_to_ptr.vmem [resolvable:$true] %s44_s23  ;;  %s1423_s26 = int_to_ptr.vmem [resolvable:$true] %s58_s26 }
  0x26   :  { %s1268_s29 = scalar_lea.hbm %s1480_s2, 1024 }
  0x27   :  { %p1269_p2 = scmp.ne.s32.totalorder %s1480_s2, %s1268_s29  ;;  %p1272_p3 = scmp.lt.u32.totalorder %s1268_s29, %s1480_s2 }
  0x29   :  { %p1274_p4 = pnand %p1272_p3, %p1269_p2 }
  0x2b   :  { %1277 = shalt.err (!%p1274_p4)
}
  0x2c   :  { %s1278_s0 = scalar_lea.vmem %s45_s23, 1024  ;;  %p1283_p6 = scmp.lt.s32.totalorder %s45_s23, %s45_s23 }
  0x2d   :  { %p1279_p5 = scmp.ne.s32.totalorder %s45_s23, %s1278_s0  ;;  %p1284_p7 = scmp.lt.s32.totalorder %s1278_s0, %s1278_s0 }
  0x2f   :  { %p1285_p8 = por %p1284_p7, %p1283_p6 }
  0x31   :  { %p1286_p9 = pnand %p1285_p8, %p1279_p5 }
  0x33   :  { %1289 = shalt.err (!%p1286_p9)
}
  0x34   :  { %50 = dma.hbm_to_vmem [thread:$0]  %s1480_s2, 1024, %s45_s23, [#allocation8], %s1344_s9, %s1344_s9, %s1345_s10  }
  0x35   :  { %s1290_s15 = scalar_lea.hbm %s1482_s4, 1024 }
  0x36   :  { %p1291_p10 = scmp.ne.s32.totalorder %s1482_s4, %s1290_s15  ;;  %p1294_p11 = scmp.lt.u32.totalorder %s1290_s15, %s1482_s4 }
  0x38   :  { %p1296_p12 = pnand %p1294_p11, %p1291_p10 }
  0x3a   :  { %1299 = shalt.err (!%p1296_p12)
}
  0x3b   :  { %s1300_s20 = scalar_lea.vmem %s1423_s26, 1024  ;;  %p1305_p0 = scmp.lt.s32.totalorder %s1423_s26, %s1423_s26 }
  0x3c   :  { %p1301_p13 = scmp.ne.s32.totalorder %s1423_s26, %s1300_s20  ;;  %p1306_p1 = scmp.lt.s32.totalorder %s1300_s20, %s1300_s20 }
  0x3e   :  { %p1307_p2 = por %p1306_p1, %p1305_p0 }
  0x40   :  { %p1308_p3 = pnand %p1307_p2, %p1301_p13 }
  0x42   :  { %1311 = shalt.err (!%p1308_p3)
}
  0x43   :  { %64 = dma.hbm_to_vmem [thread:$0]  %s1482_s4, 1024, %s1423_s26, [#allocation11], %s1344_s9, %s1344_s9, %s1345_s10  }
  0x44   :  { %1334 = dma.done.wait [#allocation5], 1024  }
  0x45   :  { %1335 = vsyncadd [#allocation5], 4294966272 }
  0x46   :  { %1336 = dma.done.wait [#allocation8], 2048  }
  0x47   :  { %1337 = vsyncadd [#allocation8], 4294965248 }
  0x48   :  { %1338 = dma.done.wait [#allocation11], 1024  }
  0x49   :  { %1339 = vsyncadd [#allocation11], 4294966272  ;;  %v1184_v0 = vld [vmem:[#allocation9] sm:$0xff]   ;;  %v1185_v1 = vld [vmem:[#allocation9 + $0x8] sm:$0xff]  }
  0x4a   :  { %1047 = vmatprep.subr.bf16.mxu0 %v1184_v0  ;;  %v1186_v2 = vld [vmem:[#allocation9 + $0x10] sm:$0xff]   ;;  %v1187_v3 = vld [vmem:[#allocation9 + $0x18] sm:$0xff]   ;;  %v1192_v4 = vld [vmem:[#allocation7] sm:$0xff]  }
  0x4b   :  { %1048 = vmatpush3.bf16.msra.mxu0 %v1184_v0  ;;  %1063 = vmatprep.mubr.bf16.mxu0 %v1192_v4  ;;  %v1188_v5 = vld [vmem:[#allocation9 + $0x20] sm:$0xff]   ;;  %v1189_v6 = vld [vmem:[#allocation9 + $0x28] sm:$0xff]   ;;  %v1190_v7 = vld [vmem:[#allocation9 + $0x30] sm:$0xff]  }
  0x4c   :  { %1049 = vmatprep.subr.bf16.mxu0 %v1185_v1  ;;  %v1191_v8 = vld [vmem:[#allocation9 + $0x38] sm:$0xff]   ;;  %v1193_v9 = vld [vmem:[#allocation7 + $0x8] sm:$0xff]   ;;  %v1194_v10 = vld [vmem:[#allocation7 + $0x10] sm:$0xff]  }
  0x4d   :  { %v1195_v11 = vld [vmem:[#allocation7 + $0x18] sm:$0xff]   ;;  %v1196_v12 = vld [vmem:[#allocation7 + $0x20] sm:$0xff]   ;;  %v1197_v13 = vld [vmem:[#allocation7 + $0x28] sm:$0xff]  }
  0x4e   :  { %v1198_v14 = vld [vmem:[#allocation7 + $0x30] sm:$0xff]   ;;  %v1199_v15 = vld [vmem:[#allocation7 + $0x38] sm:$0xff]   ;;  %v1200_v16 = vld [vmem:[#allocation4] sm:$0xff]  }
  0x4f   :  { %1050 = vmatpush3.bf16.msra.mxu0 %v1185_v1  ;;  %1095 = vmatprep.mubr.bf16.mxu1 %v1200_v16  ;;  %v1208_v17 = vld [vmem:[#allocation10] sm:$0xff]   ;;  %v1209_v18 = vld [vmem:[#allocation10 + $0x8] sm:$0xff]   ;;  %v1210_v19 = vld [vmem:[#allocation10 + $0x10] sm:$0xff]  }
  0x50   :  { %1051 = vmatprep.subr.bf16.mxu0 %v1186_v2  ;;  %v1211_v20 = vld [vmem:[#allocation10 + $0x18] sm:$0xff]   ;;  %v1212_v21 = vld [vmem:[#allocation10 + $0x20] sm:$0xff]   ;;  %v1213_v22 = vld [vmem:[#allocation10 + $0x28] sm:$0xff]  }
  0x51   :  { %v1201_v47 = vld [vmem:[#allocation4 + $0x8] sm:$0xff]   ;;  %v1202_v48 = vld [vmem:[#allocation4 + $0x10] sm:$0xff]   ;;  %v1203_v49 = vld [vmem:[#allocation4 + $0x18] sm:$0xff]  }
  0x52   :  { %v1204_v50 = vld [vmem:[#allocation4 + $0x20] sm:$0xff]   ;;  %v1205_v51 = vld [vmem:[#allocation4 + $0x28] sm:$0xff]   ;;  %v1206_v52 = vld [vmem:[#allocation4 + $0x30] sm:$0xff]  }
  0x53   :  { %1052 = vmatpush3.bf16.msra.mxu0 %v1186_v2  ;;  %v1207_v53 = vld [vmem:[#allocation4 + $0x38] sm:$0xff]   ;;  %v1214_v54 = vld [vmem:[#allocation10 + $0x30] sm:$0xff]   ;;  %v957_v56 = vld [vmem:[%s1481_s3] ss:$0 sm:$0xff] }
  0x54   :  { %1053 = vmatprep.subr.bf16.mxu0 %v1187_v3  ;;  %v1215_v55 = vld [vmem:[#allocation10 + $0x38] sm:$0xff]  }
  0x57   :  { %1054 = vmatpush3.bf16.msra.mxu0 %v1187_v3 }
  0x58   :  { %1055 = vmatprep.subr.bf16.mxu0 %v1188_v5 }
  0x5b   :  { %1056 = vmatpush3.bf16.msra.mxu0 %v1188_v5 }
  0x5c   :  { %1057 = vmatprep.subr.bf16.mxu0 %v1189_v6 }
  0x5f   :  { %1058 = vmatpush3.bf16.msra.mxu0 %v1189_v6 }
  0x60   :  { %1059 = vmatprep.subr.bf16.mxu0 %v1190_v7 }
  0x63   :  { %1060 = vmatpush3.bf16.msra.mxu0 %v1190_v7 }
  0x64   :  { %1061 = vmatprep.subr.bf16.mxu0 %v1191_v8 }
  0x67   :  { %1062 = vmatpush3.bf16.msra.mxu0 %v1191_v8 }
  0x68   :  { %1111 = vmatprep.subr.bf16.mxu0 %v1208_v17 }
  0x6a   :  { %1064 = vmatmul.mubr.bf16.vlgmr.msra.gmra.mrb[0].mxu0 %v1193_v9 }
  0x6b   :  { %1067 = vmatprep.mubr.bf16.mxu0 %v1194_v10  ;;  %1112 = vmatpush3.bf16.msra.mxu0 %v1208_v17 }
  0x6c   :  { %1113 = vmatprep.subr.bf16.mxu0 %v1209_v18 }
  0x6f   :  { %1114 = vmatpush3.bf16.msra.mxu0 %v1209_v18 }
  0x70   :  { %1115 = vmatprep.subr.bf16.mxu0 %v1210_v19 }
  0x72   :  { %1068 = vmatmul.mubr.bf16.gmra.mrb[4].mxu0 %v1195_v11 }
  0x73   :  { %1071 = vmatprep.mubr.bf16.mxu0 %v1196_v12  ;;  %1116 = vmatpush3.bf16.msra.mxu0 %v1210_v19 }
  0x74   :  { %1117 = vmatprep.subr.bf16.mxu0 %v1211_v20 }
  0x77   :  { %1118 = vmatpush3.bf16.msra.mxu0 %v1211_v20 }
  0x78   :  { %1119 = vmatprep.subr.bf16.mxu0 %v1212_v21 }
  0x7a   :  { %1072 = vmatmul.mubr.bf16.gmra.mrb[8].mxu0 %v1197_v13 }
  0x7b   :  { %1075 = vmatprep.mubr.bf16.mxu0 %v1198_v14  ;;  %1120 = vmatpush3.bf16.msra.mxu0 %v1212_v21 }
  0x7c   :  { %1121 = vmatprep.subr.bf16.mxu0 %v1213_v22 }
  0x7f   :  { %1122 = vmatpush3.bf16.msra.mxu0 %v1213_v22 }
  0x80   :  { %1123 = vmatprep.subr.bf16.mxu0 %v1214_v54 }
  0x82   :  { %1076 = vmatmul.mubr.bf16.gmra.mrb[12].mxu0 %v1199_v15 }
  0x83   :  { %1124 = vmatpush3.bf16.msra.mxu0 %v1214_v54 }
  0x84   :  { %1125 = vmatprep.subr.bf16.mxu0 %v1215_v55 }
  0x87   :  { %1126 = vmatpush3.bf16.msra.mxu0 %v1215_v55 }
 0x13d   :  { %v1065_v23 = vpop.f32.mrb[0].mxu0 }
 0x13e   :  { %v242_v24 = vpop.f32.mrb[1].mxu0 }
 0x13f   :  { %v1066_v25 = vpop.f32.mrb[2].mxu0 }
 0x140   :  { %v306_v26 = vpack.c.bf16 %v1066_v25, %v1065_v23  ;;  %v245_v27 = vpop.f32.mrb[3].mxu0 }
 0x141   :  { %v305_v28 = vpack.c.bf16 %v245_v27, %v242_v24 }
 0x143   :  { %1079 = vmatprep.subr.bf16.mxu1 %v305_v28 }
 0x144   :  { %1080 = vmatpush3.bf16.msra.mxu1 %v305_v28 }
 0x145   :  { %v1069_v29 = vpop.f32.mrb[4].mxu0  ;;  %1081 = vmatprep.subr.bf16.mxu1 %v306_v26 }
 0x146   :  { %v258_v30 = vpop.f32.mrb[5].mxu0 }
 0x147   :  { %v1070_v31 = vpop.f32.mrb[6].mxu0 }
 0x148   :  { %v308_v32 = vpack.c.bf16 %v1070_v31, %v1069_v29  ;;  %v261_v33 = vpop.f32.mrb[7].mxu0  ;;  %1082 = vmatpush3.bf16.msra.mxu1 %v306_v26 }
 0x149   :  { %v307_v34 = vpack.c.bf16 %v261_v33, %v258_v30 }
 0x14b   :  { %1083 = vmatprep.subr.bf16.mxu1 %v307_v34 }
 0x14c   :  { %1084 = vmatpush3.bf16.msra.mxu1 %v307_v34 }
 0x14d   :  { %v1073_v35 = vpop.f32.mrb[8].mxu0  ;;  %1085 = vmatprep.subr.bf16.mxu1 %v308_v32 }
 0x14e   :  { %v274_v36 = vpop.f32.mrb[9].mxu0 }
 0x14f   :  { %v1074_v37 = vpop.f32.mrb[10].mxu0 }
 0x150   :  { %v310_v38 = vpack.c.bf16 %v1074_v37, %v1073_v35  ;;  %v277_v39 = vpop.f32.mrb[11].mxu0  ;;  %1086 = vmatpush3.bf16.msra.mxu1 %v308_v32 }
 0x151   :  { %v309_v40 = vpack.c.bf16 %v277_v39, %v274_v36 }
 0x153   :  { %1087 = vmatprep.subr.bf16.mxu1 %v309_v40 }
 0x154   :  { %1088 = vmatpush3.bf16.msra.mxu1 %v309_v40 }
 0x155   :  { %v1077_v41 = vpop.f32.mrb[12].mxu0  ;;  %1089 = vmatprep.subr.bf16.mxu1 %v310_v38 }
 0x156   :  { %v290_v42 = vpop.f32.mrb[13].mxu0 }
 0x157   :  { %v1078_v43 = vpop.f32.mrb[14].mxu0 }
 0x158   :  { %v312_v44 = vpack.c.bf16 %v1078_v43, %v1077_v41  ;;  %v293_v45 = vpop.f32.mrb[15].mxu0  ;;  %1090 = vmatpush3.bf16.msra.mxu1 %v310_v38 }
 0x159   :  { %v311_v46 = vpack.c.bf16 %v293_v45, %v290_v42 }
 0x15b   :  { %1091 = vmatprep.subr.bf16.mxu1 %v311_v46 }
 0x15c   :  { %1092 = vmatpush3.bf16.msra.mxu1 %v311_v46 }
 0x15d   :  { %1093 = vmatprep.subr.bf16.mxu1 %v312_v44 }
 0x160   :  { %1094 = vmatpush3.bf16.msra.mxu1 %v312_v44 }
 0x163   :  { %1096 = vmatmul.mubr.bf16.vlgmr.msra.gmra.mrb[0].mxu1 %v1201_v47 }
 0x164   :  { %1099 = vmatprep.mubr.bf16.mxu1 %v1202_v48 }
 0x16b   :  { %1100 = vmatmul.mubr.bf16.gmra.mrb[4].mxu1 %v1203_v49  ;;  %v1216_v49 = vld [vmem:[#allocation4] sm:$0xff]  }
 0x16c   :  { %1103 = vmatprep.mubr.bf16.mxu1 %v1204_v50 }
 0x173   :  { %1104 = vmatmul.mubr.bf16.gmra.mrb[8].mxu1 %v1205_v51 }
 0x174   :  { %1107 = vmatprep.mubr.bf16.mxu1 %v1206_v52 }
 0x17b   :  { %1108 = vmatmul.mubr.bf16.gmra.mrb[12].mxu1 %v1207_v53 }
 0x17c   :  { %1159 = vmatprep.mubr.bf16.mxu1 %v1216_v49 }
 0x236   :  { %v1097_v57 = vpop.f32.mrb[0].mxu1 }
 0x237   :  { %v443_v58 = vadd.f32 %v1097_v57, %v957_v56  ;;  %v434_v59 = vpop.f32.mrb[1].mxu1 }
 0x238   :  { %v435_v60 = vadd.f32 %v957_v56, %v434_v59  ;;  %v1098_v61 = vpop.f32.mrb[2].mxu1 }
 0x239   :  { %v446_v62 = vadd.f32 %v1098_v61, %v957_v56  ;;  %v437_v63 = vpop.f32.mrb[3].mxu1  ;;  %v499_v1 = vmax.f32 %v443_v58, 0.0 }
 0x23a   :  { %v438_v0 = vadd.f32 %v957_v56, %v437_v63  ;;  %v497_v3 = vmax.f32 %v435_v60, 0.0 }
 0x23b   :  { %v500_v2 = vmax.f32 %v446_v62, 0.0 }
 0x23c   :  { %v498_v4 = vmax.f32 %v438_v0, 0.0 }
 0x23d   :  { %v514_v5 = vpack.c.bf16 %v500_v2, %v499_v1 }
 0x23e   :  { %v513_v6 = vpack.c.bf16 %v498_v4, %v497_v3  ;;  %v1101_v7 = vpop.f32.mrb[4].mxu1 }
 0x23f   :  { %v459_v8 = vadd.f32 %v1101_v7, %v957_v56  ;;  %v450_v9 = vpop.f32.mrb[5].mxu1 }
 0x240   :  { %v451_v10 = vadd.f32 %v957_v56, %v450_v9  ;;  %v1102_v11 = vpop.f32.mrb[6].mxu1  ;;  %1127 = vmatprep.mubr.bf16.mxu0 %v513_v6 }
 0x241   :  { %v462_v12 = vadd.f32 %v1102_v11, %v957_v56  ;;  %v453_v13 = vpop.f32.mrb[7].mxu1  ;;  %1128 = vmatmul.mubr.bf16.vlgmr.msra.gmra.mrb[16].mxu0 %v514_v5  ;;  %v503_v15 = vmax.f32 %v459_v8, 0.0  ;;  %v1218_v11 = vld [vmem:[#allocation4 + $0x10] sm:$0xff]  }
 0x242   :  { %v454_v14 = vadd.f32 %v957_v56, %v453_v13  ;;  %v501_v17 = vmax.f32 %v451_v10, 0.0  ;;  %v1217_v10 = vld [vmem:[#allocation4 + $0x8] sm:$0xff]   ;;  %v1220_v13 = vld [vmem:[#allocation4 + $0x20] sm:$0xff]  }
 0x243   :  { %v504_v16 = vmax.f32 %v462_v12, 0.0  ;;  %v1219_v12 = vld [vmem:[#allocation4 + $0x18] sm:$0xff]  }
 0x244   :  { %v502_v18 = vmax.f32 %v454_v14, 0.0  ;;  %v1221_v14 = vld [vmem:[#allocation4 + $0x28] sm:$0xff]  }
 0x245   :  { %v516_v19 = vpack.c.bf16 %v504_v16, %v503_v15  ;;  %v1222_v15 = vld [vmem:[#allocation4 + $0x30] sm:$0xff]   ;;  %v1223_v16 = vld [vmem:[#allocation4 + $0x38] sm:$0xff]  }
 0x246   :  { %v515_v20 = vpack.c.bf16 %v502_v18, %v501_v17  ;;  %v1105_v21 = vpop.f32.mrb[8].mxu1  ;;  %v974_v17 = vld [vmem:[%s1483_s5] ss:$0 sm:$0xff]  ;;  %s1348_s5 = smov [#allocation12]  }
 0x247   :  { %v475_v22 = vadd.f32 %v1105_v21, %v957_v56  ;;  %v466_v23 = vpop.f32.mrb[9].mxu1  ;;  %s927_s21 = sshll.u32 %s1348_s5, 4  ;;  %s928_s21 = int_to_ptr.vmem [resolvable:$true] %s927_s21 }
 0x248   :  { %v467_v24 = vadd.f32 %v957_v56, %v466_v23  ;;  %v1106_v25 = vpop.f32.mrb[10].mxu1  ;;  %1131 = vmatprep.mubr.bf16.mxu0 %v515_v20  ;;  %s1312_s22 = scalar_lea.vmem %s928_s21, 2048  ;;  %p1317_p5 = scmp.lt.s32.totalorder %s928_s21, %s928_s21 }
 0x249   :  { %v478_v26 = vadd.f32 %v1106_v25, %v957_v56  ;;  %v469_v27 = vpop.f32.mrb[11].mxu1  ;;  %1132 = vmatmul.mubr.bf16.gmra.mrb[20].mxu0 %v516_v19  ;;  %v507_v29 = vmax.f32 %v475_v22, 0.0  ;;  %p1313_p4 = scmp.ne.s32.totalorder %s928_s21, %s1312_s22  ;;  %p1318_p6 = scmp.lt.s32.totalorder %s1312_s22, %s1312_s22 }
 0x24a   :  { %v470_v28 = vadd.f32 %v957_v56, %v469_v27  ;;  %v505_v31 = vmax.f32 %v467_v24, 0.0 }
 0x24b   :  { %v508_v30 = vmax.f32 %v478_v26, 0.0  ;;  %p1319_p7 = por %p1318_p6, %p1317_p5 }
 0x24c   :  { %v506_v32 = vmax.f32 %v470_v28, 0.0 }
 0x24d   :  { %v518_v33 = vpack.c.bf16 %v508_v30, %v507_v29  ;;  %p1320_p8 = pnand %p1319_p7, %p1313_p4 }
 0x24e   :  { %v517_v34 = vpack.c.bf16 %v506_v32, %v505_v31  ;;  %v1109_v35 = vpop.f32.mrb[12].mxu1 }
 0x24f   :  { %v491_v36 = vadd.f32 %v1109_v35, %v957_v56  ;;  %v482_v37 = vpop.f32.mrb[13].mxu1 }
 0x250   :  { %v483_v38 = vadd.f32 %v957_v56, %v482_v37  ;;  %v1110_v39 = vpop.f32.mrb[14].mxu1  ;;  %1135 = vmatprep.mubr.bf16.mxu0 %v517_v34 }
 0x251   :  { %v494_v40 = vadd.f32 %v1110_v39, %v957_v56  ;;  %v485_v41 = vpop.f32.mrb[15].mxu1  ;;  %1136 = vmatmul.mubr.bf16.gmra.mrb[24].mxu0 %v518_v33  ;;  %v511_v43 = vmax.f32 %v491_v36, 0.0 }
 0x252   :  { %v486_v42 = vadd.f32 %v957_v56, %v485_v41  ;;  %v509_v45 = vmax.f32 %v483_v38, 0.0 }
 0x253   :  { %v512_v44 = vmax.f32 %v494_v40, 0.0 }
 0x254   :  { %v510_v46 = vmax.f32 %v486_v42, 0.0 }
 0x255   :  { %v520_v47 = vpack.c.bf16 %v512_v44, %v511_v43 }
 0x256   :  { %v519_v48 = vpack.c.bf16 %v510_v46, %v509_v45 }
 0x258   :  { %1139 = vmatprep.mubr.bf16.mxu0 %v519_v48 }
 0x259   :  { %1140 = vmatmul.mubr.bf16.gmra.mrb[28].mxu0 %v520_v47 }
 0x314   :  { %v1129_v50 = vpop.f32.mrb[16].mxu0 }
 0x315   :  { %v635_v51 = vpop.f32.mrb[17].mxu0 }
 0x316   :  { %v1130_v52 = vpop.f32.mrb[18].mxu0 }
 0x317   :  { %v699_v53 = vpack.c.bf16 %v1130_v52, %v1129_v50  ;;  %v638_v54 = vpop.f32.mrb[19].mxu0 }
 0x318   :  { %v698_v55 = vpack.c.bf16 %v638_v54, %v635_v51 }
 0x31a   :  { %1143 = vmatprep.subr.bf16.mxu1 %v698_v55 }
 0x31b   :  { %1144 = vmatpush3.bf16.msra.mxu1 %v698_v55 }
 0x31c   :  { %v1133_v57 = vpop.f32.mrb[20].mxu0  ;;  %1145 = vmatprep.subr.bf16.mxu1 %v699_v53 }
 0x31d   :  { %v651_v56 = vpop.f32.mrb[21].mxu0 }
 0x31e   :  { %v1134_v58 = vpop.f32.mrb[22].mxu0 }
 0x31f   :  { %v701_v59 = vpack.c.bf16 %v1134_v58, %v1133_v57  ;;  %v654_v60 = vpop.f32.mrb[23].mxu0  ;;  %1146 = vmatpush3.bf16.msra.mxu1 %v699_v53 }
 0x320   :  { %v700_v61 = vpack.c.bf16 %v654_v60, %v651_v56 }
 0x322   :  { %1147 = vmatprep.subr.bf16.mxu1 %v700_v61 }
 0x323   :  { %1148 = vmatpush3.bf16.msra.mxu1 %v700_v61 }
 0x324   :  { %v1137_v62 = vpop.f32.mrb[24].mxu0  ;;  %1149 = vmatprep.subr.bf16.mxu1 %v701_v59 }
 0x325   :  { %v667_v63 = vpop.f32.mrb[25].mxu0 }
 0x326   :  { %v1138_v0 = vpop.f32.mrb[26].mxu0 }
 0x327   :  { %v703_v1 = vpack.c.bf16 %v1138_v0, %v1137_v62  ;;  %v670_v2 = vpop.f32.mrb[27].mxu0  ;;  %1150 = vmatpush3.bf16.msra.mxu1 %v701_v59 }
 0x328   :  { %v702_v3 = vpack.c.bf16 %v670_v2, %v667_v63 }
 0x32a   :  { %1151 = vmatprep.subr.bf16.mxu1 %v702_v3 }
 0x32b   :  { %1152 = vmatpush3.bf16.msra.mxu1 %v702_v3 }
 0x32c   :  { %v1141_v4 = vpop.f32.mrb[28].mxu0  ;;  %1153 = vmatprep.subr.bf16.mxu1 %v703_v1 }
 0x32d   :  { %v683_v5 = vpop.f32.mrb[29].mxu0 }
 0x32e   :  { %v1142_v6 = vpop.f32.mrb[30].mxu0 }
 0x32f   :  { %v705_v7 = vpack.c.bf16 %v1142_v6, %v1141_v4  ;;  %v686_v8 = vpop.f32.mrb[31].mxu0  ;;  %1154 = vmatpush3.bf16.msra.mxu1 %v703_v1 }
 0x330   :  { %v704_v9 = vpack.c.bf16 %v686_v8, %v683_v5 }
 0x332   :  { %1155 = vmatprep.subr.bf16.mxu1 %v704_v9 }
 0x333   :  { %1156 = vmatpush3.bf16.msra.mxu1 %v704_v9 }
 0x334   :  { %1157 = vmatprep.subr.bf16.mxu1 %v705_v7 }
 0x337   :  { %1158 = vmatpush3.bf16.msra.mxu1 %v705_v7 }
 0x33a   :  { %1160 = vmatmul.mubr.bf16.vlgmr.msra.gmra.mrb[16].mxu1 %v1217_v10 }
 0x33b   :  { %1163 = vmatprep.mubr.bf16.mxu1 %v1218_v11 }
 0x342   :  { %1164 = vmatmul.mubr.bf16.gmra.mrb[20].mxu1 %v1219_v12 }
 0x343   :  { %1167 = vmatprep.mubr.bf16.mxu1 %v1220_v13 }
 0x34a   :  { %1168 = vmatmul.mubr.bf16.gmra.mrb[24].mxu1 %v1221_v14 }
 0x34b   :  { %1171 = vmatprep.mubr.bf16.mxu1 %v1222_v15 }
 0x352   :  { %1172 = vmatmul.mubr.bf16.gmra.mrb[28].mxu1 %v1223_v16 }
 0x40d   :  { %v1161_v18 = vpop.f32.mrb[16].mxu1 }
 0x40e   :  { %v836_v19 = vadd.f32 %v1161_v18, %v974_v17  ;;  %v827_v20 = vpop.f32.mrb[17].mxu1 }
 0x40f   :  { %v828_v21 = vadd.f32 %v974_v17, %v827_v20  ;;  %v1162_v22 = vpop.f32.mrb[18].mxu1 }
 0x410   :  { %v892_v23 = vmax.f32 %v836_v19, 0.0  ;;  %v839_v24 = vadd.f32 %v1162_v22, %v974_v17  ;;  %v830_v25 = vpop.f32.mrb[19].mxu1 }
 0x411   :  { %v890_v26 = vmax.f32 %v828_v21, 0.0  ;;  %v831_v27 = vadd.f32 %v974_v17, %v830_v25 }
 0x412   :  { %908 = vst [vmem:[#allocation12 + $0x10] sm:$0xff] %v892_v23  ;;  %v893_v28 = vmax.f32 %v839_v24, 0.0 }
 0x413   :  { %906 = vst [vmem:[#allocation12] sm:$0xff] %v890_v26  ;;  %v891_v29 = vmax.f32 %v831_v27, 0.0 }
 0x414   :  { %909 = vst [vmem:[#allocation12 + $0x18] sm:$0xff] %v893_v28 }
 0x415   :  { %907 = vst [vmem:[#allocation12 + $0x8] sm:$0xff] %v891_v29  ;;  %v1165_v30 = vpop.f32.mrb[20].mxu1 }
 0x416   :  { %v852_v31 = vadd.f32 %v1165_v30, %v974_v17  ;;  %v843_v32 = vpop.f32.mrb[21].mxu1 }
 0x417   :  { %v844_v33 = vadd.f32 %v974_v17, %v843_v32  ;;  %v1166_v34 = vpop.f32.mrb[22].mxu1 }
 0x418   :  { %v896_v35 = vmax.f32 %v852_v31, 0.0  ;;  %v855_v36 = vadd.f32 %v1166_v34, %v974_v17  ;;  %v846_v37 = vpop.f32.mrb[23].mxu1 }
 0x419   :  { %v894_v38 = vmax.f32 %v844_v33, 0.0  ;;  %v847_v39 = vadd.f32 %v974_v17, %v846_v37 }
 0x41a   :  { %912 = vst [vmem:[#allocation12 + $0x30] sm:$0xff] %v896_v35  ;;  %v897_v40 = vmax.f32 %v855_v36, 0.0 }
 0x41b   :  { %910 = vst [vmem:[#allocation12 + $0x20] sm:$0xff] %v894_v38  ;;  %v895_v41 = vmax.f32 %v847_v39, 0.0 }
 0x41c   :  { %913 = vst [vmem:[#allocation12 + $0x38] sm:$0xff] %v897_v40 }
 0x41d   :  { %911 = vst [vmem:[#allocation12 + $0x28] sm:$0xff] %v895_v41  ;;  %v1169_v42 = vpop.f32.mrb[24].mxu1 }
 0x41e   :  { %v868_v43 = vadd.f32 %v1169_v42, %v974_v17  ;;  %v859_v44 = vpop.f32.mrb[25].mxu1 }
 0x41f   :  { %v860_v45 = vadd.f32 %v974_v17, %v859_v44  ;;  %v1170_v46 = vpop.f32.mrb[26].mxu1 }
 0x420   :  { %v900_v47 = vmax.f32 %v868_v43, 0.0  ;;  %v871_v48 = vadd.f32 %v1170_v46, %v974_v17  ;;  %v862_v49 = vpop.f32.mrb[27].mxu1 }
 0x421   :  { %v898_v50 = vmax.f32 %v860_v45, 0.0  ;;  %v863_v51 = vadd.f32 %v974_v17, %v862_v49 }
 0x422   :  { %916 = vst [vmem:[#allocation12 + $0x50] sm:$0xff] %v900_v47  ;;  %v901_v52 = vmax.f32 %v871_v48, 0.0 }
 0x423   :  { %914 = vst [vmem:[#allocation12 + $0x40] sm:$0xff] %v898_v50  ;;  %v899_v53 = vmax.f32 %v863_v51, 0.0 }
 0x424   :  { %917 = vst [vmem:[#allocation12 + $0x58] sm:$0xff] %v901_v52 }
 0x425   :  { %915 = vst [vmem:[#allocation12 + $0x48] sm:$0xff] %v899_v53  ;;  %v1173_v54 = vpop.f32.mrb[28].mxu1 }
 0x426   :  { %v884_v55 = vadd.f32 %v1173_v54, %v974_v17  ;;  %v875_v57 = vpop.f32.mrb[29].mxu1 }
 0x427   :  { %v876_v56 = vadd.f32 %v974_v17, %v875_v57  ;;  %v1174_v58 = vpop.f32.mrb[30].mxu1 }
 0x428   :  { %v904_v59 = vmax.f32 %v884_v55, 0.0  ;;  %v887_v60 = vadd.f32 %v1174_v58, %v974_v17  ;;  %v878_v61 = vpop.f32.mrb[31].mxu1 }
 0x429   :  { %v902_v62 = vmax.f32 %v876_v56, 0.0  ;;  %v879_v63 = vadd.f32 %v974_v17, %v878_v61 }
 0x42a   :  { %920 = vst [vmem:[#allocation12 + $0x70] sm:$0xff] %v904_v59  ;;  %v905_v0 = vmax.f32 %v887_v60, 0.0 }
 0x42b   :  { %918 = vst [vmem:[#allocation12 + $0x60] sm:$0xff] %v902_v62  ;;  %v903_v1 = vmax.f32 %v879_v63, 0.0 }
 0x42c   :  { %921 = vst [vmem:[#allocation12 + $0x78] sm:$0xff] %v905_v0 }
 0x42d   :  { %919 = vst [vmem:[#allocation12 + $0x68] sm:$0xff] %v903_v1 }
 0x42e   :  { %1323 = shalt.err (!%p1320_p8)
}
 0x42f   :  { %s1324_s26 = scalar_lea.hbm %s1484_s6, 2048 }
 0x430   :  { %p1325_p9 = scmp.ne.s32.totalorder %s1484_s6, %s1324_s26  ;;  %p1328_p10 = scmp.lt.u32.totalorder %s1324_s26, %s1484_s6 }
 0x432   :  { %p1330_p11 = pnand %p1328_p10, %p1325_p9 }
 0x434   :  { %1333 = shalt.err (!%p1330_p11)
}
 0x435   :  { %s1349_s7 = smov 128   ;;  %s1350_s8 = smov 8  }
 0x436   :  { %933 = dma.vmem_to_hbm [thread:$0]  %s928_s21, 2048, %s1484_s6, [#allocation6], %s1349_s7, %s1349_s7, %s1350_s8  }
 0x437   :  { %1340 = dma.done.wait [#allocation6], 2048  }
 0x438   :  { %1341 = vsyncadd [#allocation6], 4294965248 }
 0x439   :  { %937 = vsyncpa [#allocation5], 1 }
 0x43a   :  { %938 = vsyncpa [#allocation8], 1 }
 0x43b   :  { %939 = vsyncpa [#allocation11], 1 }
 0x43c   :  { %940 = vsyncpa [#allocation6], 1 }

</bundles_post_ra>
